<compile_context>
chip_gen: v6e
topology: v6e:2x2x1
jax: 0.10.0
libtpu: 0.0.40
codegen_flags: <defaults>
</compile_context>

<pallas_src>
import jax
import jax.numpy as jnp
from jax.experimental import pallas as pl
from jax.experimental.pallas import tpu as pltpu

_LANE_CHOICES = (1024, 512, 256, 128)   # lane-dense widths (multiples of 128)
_TARGET_BLOCK_BYTES = 4 * 1024 * 1024   # ~4 MiB per block, any dtype
_SPLIT_MIN_BYTES = 1 * 1024 * 1024      # split single-block inputs >= 1 MiB (v7x megacore)


def _actv_kernel(x_ref, o_ref):
    x = x_ref[...]
    o_ref[...] = jnp.maximum(x, x * 0.2)


def _run_pallas_2d(x2d: jax.Array) -> jax.Array:
    """Run the elementwise kernel on a (rows, lanes) slab; lanes % 128 == 0."""
    rows, lanes = x2d.shape
    itemsize = jnp.dtype(x2d.dtype).itemsize
    # Sublane-pack multiple for the second-to-last dim of a block.
    pack = max(8, 32 // itemsize)

    # Dtype-scaled block rows: ~_TARGET_BLOCK_BYTES per block.
    tm = max(pack, (_TARGET_BLOCK_BYTES // (lanes * itemsize)) // pack * pack)

    if tm >= rows:
        if rows >= 2 * pack and rows * lanes * itemsize >= _SPLIT_MIN_BYTES:
            # Mid-size input: split into 2 balanced blocks so both v7x
            # TensorCores get work under dimension_semantics=("parallel",).
            half = -(-rows // 2)                # ceil(rows / 2)
            tm = -(-half // pack) * pack        # round up to pack multiple
        else:
            # Small input: one block covering the full slab (full-dim
            # exception to the (8,128) rule on the row axis).
            tm = rows

    grid = (pl.cdiv(rows, tm),)                 # partial final block is OK

    return pl.pallas_call(
        _actv_kernel,
        out_shape=jax.ShapeDtypeStruct((rows, lanes), x2d.dtype),
        grid=grid,
        in_specs=[pl.BlockSpec((tm, lanes), lambda i: (i, 0))],
        out_specs=pl.BlockSpec((tm, lanes), lambda i: (i, 0)),
        compiler_params=pltpu.CompilerParams(
            dimension_semantics=("parallel",),
            vmem_limit_bytes=32 * 1024 * 1024,
        ),
        cost_estimate=pl.CostEstimate(
            flops=2 * rows * lanes,
            bytes_accessed=2 * rows * lanes * itemsize,
            transcendentals=0,
        ),
    )(x2d)


def actv_layer(x: jax.Array) -> jax.Array:
    """Elementwise max(x, 0.2*x) on a floating-point tensor of any shape."""
    if not jnp.issubdtype(x.dtype, jnp.floating):
        raise TypeError("actv_layer expects a floating-point dtype, got "
                        f"{x.dtype}")
    total = x.size
    if total == 0:
        return x

    # Fast path: flattened size divides a multiple-of-128 lane width ->
    # free reshape, no pad, no slice, no tail.
    for lanes in _LANE_CHOICES:
        if total % lanes == 0:
            out2d = _run_pallas_2d(x.reshape(total // lanes, lanes))
            return out2d.reshape(x.shape)

    # Awkward tail (total % 128 != 0): kernel on the 1024-aligned prefix,
    # remainder (< 1024 elements) handled directly in jnp.
    x_flat = x.reshape(-1)
    n_main = (total // 1024) * 1024
    if n_main == 0:
        return jnp.maximum(x, x * 0.2)
    main = _run_pallas_2d(x_flat[:n_main].reshape(n_main // 1024, 1024))
    tail_in = x_flat[n_main:]
    tail = jnp.maximum(tail_in, tail_in * 0.2)
    return jnp.concatenate([main.reshape(-1), tail]).reshape(x.shape)


if __name__ == "__main__":
    key = jax.random.PRNGKey(0)

    # Main example: NCHW input, batch=2, channels=4, spatial=16x16.
    x = jax.random.normal(key, (2, 4, 16, 16), dtype=jnp.float32)
    out = jax.block_until_ready(actv_layer(x))
    ref = jnp.maximum(x, x * 0.2)
    assert out.shape == x.shape and out.dtype == x.dtype
    assert jnp.allclose(out, ref, atol=1e-6), "mismatch vs reference"

    # Multi-row single-block path (rows not a multiple of 8, total % 1024 == 0).
    x_b = jax.random.normal(jax.random.PRNGKey(1), (3, 8, 64, 100),
                            dtype=jnp.float32)
    out_b = jax.block_until_ready(actv_layer(x_b))
    assert jnp.allclose(out_b, jnp.maximum(x_b, x_b * 0.2), atol=1e-6)

    # Awkward-tail path (total % 128 != 0): kernel prefix + jnp tail.
    x_t = jax.random.normal(jax.random.PRNGKey(2), (5, 17, 23),
                            dtype=jnp.float32)
    out_t = jax.block_until_ready(actv_layer(x_t))
    assert jnp.allclose(out_t, jnp.maximum(x_t, x_t * 0.2), atol=1e-6)

    # bf16 + balanced 2-block split path (>= 1 MiB, would otherwise be 1 block).
    x_h = jax.random.normal(jax.random.PRNGKey(3), (2, 512, 1024),
                            dtype=jnp.bfloat16)
    out_h = jax.block_until_ready(actv_layer(x_h))
    ref_h = jnp.maximum(x_h, x_h * 0.2)
    assert out_h.dtype == jnp.bfloat16
    assert jnp.allclose(out_h.astype(jnp.float32), ref_h.astype(jnp.float32),
                        atol=1e-2)

    print("KERNEL_OK")
</pallas_src>

<mosaic_0001>
module attributes {stable_mosaic.version = 11 : i64} {
  func.func @_actv_kernel(%arg0: i32, %arg1: memref<2x1024xf32, #tpu.memory_space<vmem>>, %arg2: memref<2x1024xf32, #tpu.memory_space<vmem>>) attributes {dimension_semantics = [#tpu.dimension_semantics<parallel>], iteration_bounds = array<i64: 1>, scalar_prefetch = 0 : i64, scratch_operands = 0 : i64, tpu.core_type = #tpu.core_type<tc>, window_params = [{transform_indices = @transform_0, window_bounds = array<i64: 2, 1024>}, {transform_indices = @transform_1, window_bounds = array<i64: 2, 1024>}]} {
    %c0 = arith.constant 0 : index
    %c0_0 = arith.constant 0 : index
    %0 = vector.load %arg1[%c0, %c0_0] : memref<2x1024xf32, #tpu.memory_space<vmem>>, vector<2x1024xf32>
    %cst = arith.constant 2.000000e-01 : f32
    %1 = vector.broadcast %cst : f32 to vector<2x1024xf32>
    %2 = arith.mulf %0, %1 : vector<2x1024xf32>
    %3 = arith.maximumf %0, %2 : vector<2x1024xf32>
    %c0_1 = arith.constant 0 : index
    %c0_2 = arith.constant 0 : index
    %4 = vector.load %arg2[%c0_1, %c0_2] : memref<2x1024xf32, #tpu.memory_space<vmem>>, vector<2x1024xf32>
    tpu.vector_store %arg2[%c0_1, %c0_2], %3 {strides = array<i32>} : memref<2x1024xf32, #tpu.memory_space<vmem>>, vector<2x1024xf32>,
    return
  }
  func.func @transform_0(%arg0: i32) -> (i32, i32) {
    %c0_i32 = arith.constant 0 : i32
    %c0_i32_0 = arith.constant 0 : i32
    return %arg0, %c0_i32 : i32, i32
  }
  func.func @transform_1(%arg0: i32) -> (i32, i32) {
    %c0_i32 = arith.constant 0 : i32
    %c0_i32_0 = arith.constant 0 : i32
    return %arg0, %c0_i32 : i32, i32
  }
}

</mosaic_0001>

<bundles_post_ra>
// kernel: tpu_custom_call.1
= control target key start
LH: loop header
LB: loop body
LE: loop exit
PB: predicated region body
PF: predicated region fallthrough
CT: control target
= control target key end

     0   :  { %6 = vsyncpa [#allocation3], 0  ;;  %s108_s0 = inlined_call_operand.hbm [shape: f32[2,1024], index: 0, kind: input, shape index: {}]   ;;  %s109_s1 = inlined_call_operand.hbm [shape: f32[2,1024], index: 1, kind: output, shape index: {}]  }
   0x1   :  { %7 = vsyncpa [#allocation4], 0  ;;  %s90_s6 = smov [#allocation2]  }
   0x2   :  { %s14_s7 = sshll.u32 %s90_s6, 4  ;;  %s15_s7 = int_to_ptr.vmem [resolvable:$true] %s14_s7 }
   0x3   :  { %s54_s8 = scalar_lea.vmem %s15_s7, 256  ;;  %p59_p1 = scmp.lt.s32.totalorder %s15_s7, %s15_s7 }
   0x4   :  { %p55_p0 = scmp.ne.s32.totalorder %s15_s7, %s54_s8  ;;  %p60_p2 = scmp.lt.s32.totalorder %s54_s8, %s54_s8 }
   0x6   :  { %p61_p3 = por %p60_p2, %p59_p1 }
   0x8   :  { %p62_p4 = pnand %p61_p3, %p55_p0 }
   0xa   :  { %65 = shalt.err (!%p62_p4)
}
   0xb   :  { %17 = dma.hbm_to_vmem [thread:$0]  %s108_s0, 256, %s15_s7, [#allocation3]  }
   0xc   :  { %86 = dma.done.wait [#allocation3], 256  }
   0xd   :  { %87 = vsyncadd [#allocation3], 4294967040  ;;  %v21_v0 = vld [vmem:[#allocation2] sm:$0xff]  ;;  %v22_v1 = vld [vmem:[#allocation2 + $0x8] sm:$0xff]  ;;  %s91_s11 = smov [#allocation5]  }
   0xe   :  { %s35_s12 = sshll.u32 %s91_s11, 4  ;;  %v23_v2 = vmul.f32 0.2, %v21_v0  ;;  %v24_v3 = vmul.f32 0.2, %v22_v1  ;;  %s36_s12 = int_to_ptr.vmem [resolvable:$true] %s35_s12 }
   0xf   :  { %s66_s13 = scalar_lea.vmem %s36_s12, 256  ;;  %p71_p6 = scmp.lt.s32.totalorder %s36_s12, %s36_s12 }
  0x10   :  { %v25_v4 = vmax.f32 %v21_v0, %v23_v2  ;;  %v26_v5 = vmax.f32 %v22_v1, %v24_v3  ;;  %p67_p5 = scmp.ne.s32.totalorder %s36_s12, %s66_s13  ;;  %p72_p7 = scmp.lt.s32.totalorder %s66_s13, %s66_s13 }
  0x12   :  { %27 = vst [vmem:[#allocation5] sm:$0xff] %v25_v4  ;;  %28 = vst [vmem:[#allocation5 + $0x8] sm:$0xff] %v26_v5  ;;  %p73_p8 = por %p72_p7, %p71_p6 }
  0x14   :  { %p74_p9 = pnand %p73_p8, %p67_p5 }
  0x16   :  { %77 = shalt.err (!%p74_p9)
}
  0x17   :  { %38 = dma.vmem_to_hbm [thread:$0]  %s36_s12, 256, %s109_s1, [#allocation4]  }
  0x18   :  { %88 = dma.done.wait [#allocation4], 256  }
  0x19   :  { %89 = vsyncadd [#allocation4], 4294967040 }
  0x1a   :  { %42 = vsyncpa [#allocation3], 1 }
  0x1b   :  { %43 = vsyncpa [#allocation4], 1 }

</bundles_post_ra>
